<compile_context>
chip_gen: v5e
topology: v5e:2x2
jax: 0.10.0
libtpu: 0.0.40
codegen_flags: <defaults>
</compile_context>

<pallas_src>
import functools

import jax
import jax.numpy as jnp
from jax.experimental import pallas as pl
from jax.experimental.pallas import tpu as pltpu


def _mlp_kernel(n_hidden, xT_ref, *refs):
    """Fused MLP on a (D_in, tile_b) activation tile (batch on lanes)."""
    o_ref = refs[-1]
    params = refs[:-1]  # W0, b0, W1, b1, ..., w_out_col, b_out

    cdt = xT_ref.dtype
    h = xT_ref[...]  # (D_in, tile_b)
    for li in range(n_hidden):
        w = params[2 * li][...]          # (D_out, D_in), compute dtype
        b = params[2 * li + 1][...]      # (D_out, 1), f32
        a = jnp.dot(w, h, preferred_element_type=jnp.float32) + b
        h = jnp.maximum(a, 0.0).astype(cdt)  # (D_out, tile_b)

    w_out = params[2 * n_hidden][...]        # (D_last, 1), f32
    b_out = params[2 * n_hidden + 1][...]    # (1, 1), f32
    # Final 1-unit layer as VPU multiply + cross-sublane (XLU) reduce:
    # avoids an MXU pass that would fill only a single result column and
    # produces the logits already lane-dense as (1, tile_b).
    logits = jnp.sum(h.astype(jnp.float32) * w_out, axis=0, keepdims=True) + b_out
    o_ref[...] = jax.nn.sigmoid(logits)      # (1, tile_b)


def _pick_tile_b(B, max_tile=1024):
    """Largest lane-multiple tile <= max_tile, keeping >=2 grid steps when possible."""
    b128 = pl.cdiv(B, 128) * 128
    if b128 <= 128:
        return 128
    half = max(128, (b128 // 2) // 128 * 128)  # >=2 steps -> v7x megacore sharding
    return min(max_tile, half)


@functools.partial(jax.jit, static_argnames=("compute_dtype", "max_tile_b"))
def linear_and_out(x, weights, biases, *, compute_dtype=jnp.float32,
                   max_tile_b=1024):
    """Run the fused kernel.

    x:       (B, linear_size[0]) float32
    weights: PyTorch-layout weights, list of (D_out, D_in); last is (1, D_last)
    biases:  list of (D_out,); last is (1,)
    returns: (B,) float32 in [0, 1]
    """
    B, d_in = x.shape
    n_hidden = len(weights) - 1

    tile_b = _pick_tile_b(B, max_tile_b)
    b_pad = pl.cdiv(B, tile_b) * tile_b
    grid = (b_pad // tile_b,)

    # Batch on the lane axis; pad to a multiple of tile_b lanes (only if needed).
    xT = x.T.astype(compute_dtype)
    if b_pad != B:
        xT = jnp.pad(xT, ((0, 0), (0, b_pad - B)))

    args = [xT]
    in_specs = [pl.BlockSpec((d_in, tile_b), lambda i: (0, i))]
    for li in range(n_hidden):
        w = weights[li].astype(compute_dtype)                 # (D_out, D_in)
        b = biases[li].astype(jnp.float32).reshape(-1, 1)     # (D_out, 1)
        args += [w, b]
        # Grid-invariant index_map -> kept resident in VMEM across all steps.
        in_specs += [pl.BlockSpec(w.shape, lambda i: (0, 0)),
                     pl.BlockSpec(b.shape, lambda i: (0, 0))]
    w_out = weights[-1].astype(jnp.float32).reshape(-1, 1)    # (D_last, 1)
    b_out = biases[-1].astype(jnp.float32).reshape(1, 1)      # (1, 1)
    args += [w_out, b_out]
    in_specs += [pl.BlockSpec(w_out.shape, lambda i: (0, 0)),
                 pl.BlockSpec(b_out.shape, lambda i: (0, 0))]

    out = pl.pallas_call(
        functools.partial(_mlp_kernel, n_hidden),
        out_shape=jax.ShapeDtypeStruct((1, b_pad), jnp.float32),
        grid_spec=pltpu.PrefetchScalarGridSpec(
            num_scalar_prefetch=0,
            grid=grid,
            in_specs=in_specs,
            # Lane-dense output block: batch on the lane axis, full 128+ lanes.
            out_specs=pl.BlockSpec((1, tile_b), lambda i: (0, i)),
        ),
        compiler_params=pltpu.CompilerParams(
            dimension_semantics=("parallel",)
        ),
    )(*args)
    return out[0, :B]


def init_params(key, linear_size):
    """Deterministic init mirroring LinearAndOut.__init__ (PyTorch layout).

    weight ~ truncated_normal(std=0.1); bias ~ U(-1/sqrt(fan_in), 1/sqrt(fan_in)).
    """
    dims = list(linear_size) + [1]  # final output Linear -> 1
    weights, biases = [], []
    for d_in, d_out in zip(dims[:-1], dims[1:]):
        kw, kb, key = jax.random.split(key, 3)
        w = 0.1 * jax.random.truncated_normal(
            kw, -2.0, 2.0, (d_out, d_in), dtype=jnp.float32
        )
        bound = 1.0 / float(d_in) ** 0.5
        b = jax.random.uniform(
            kb, (d_out,), minval=-bound, maxval=bound, dtype=jnp.float32
        )
        weights.append(w)
        biases.append(b)
    return weights, biases


def _reference(x, weights, biases):
    h = x
    for w, b in zip(weights[:-1], biases[:-1]):
        h = jnp.maximum(h @ w.T + b, 0.0)
    return jax.nn.sigmoid(jnp.squeeze(h @ weights[-1].T + biases[-1], -1))


if __name__ == "__main__":
    key = jax.random.PRNGKey(0)
    linear_size = [32, 64, 32]  # as passed to LinearAndOut(linear_size)
    batch = 16

    kx, kp = jax.random.split(key)
    x = jax.random.normal(kx, (batch, linear_size[0]), dtype=jnp.float32)
    weights, biases = init_params(kp, linear_size)

    # Small batch, f32 path, tight tolerance.
    y = jax.block_until_ready(linear_and_out(x, weights, biases))
    y_ref = _reference(x, weights, biases)
    assert y.shape == (batch,)
    assert jnp.allclose(y, y_ref, atol=1e-5, rtol=1e-5)

    # Larger non-aligned batch: exercises padding + a 2-step parallel grid.
    x2 = jax.random.normal(jax.random.PRNGKey(1), (1000, linear_size[0]),
                           dtype=jnp.float32)
    y2 = jax.block_until_ready(linear_and_out(x2, weights, biases))
    y2_ref = _reference(x2, weights, biases)
    assert y2.shape == (1000,)
    assert jnp.allclose(y2, y2_ref, atol=1e-5, rtol=1e-5)

    # bf16 activation/weight path (v6e/v7x perf option), f32 accumulation.
    y3 = jax.block_until_ready(
        linear_and_out(x2, weights, biases, compute_dtype=jnp.bfloat16)
    )
    assert jnp.allclose(y3, y2_ref, atol=3e-2, rtol=0)

    print("KERNEL_OK")
</pallas_src>

<mosaic_0001>
module attributes {stable_mosaic.version = 11 : i64} {
  func.func @_mlp_kernel(%arg0: i32, %arg1: memref<32x128xf32, #tpu.memory_space<vmem>>, %arg2: memref<64x32xf32, #tpu.memory_space<vmem>>, %arg3: memref<64x1xf32, #tpu.memory_space<vmem>>, %arg4: memref<32x64xf32, #tpu.memory_space<vmem>>, %arg5: memref<32x1xf32, #tpu.memory_space<vmem>>, %arg6: memref<32x1xf32, #tpu.memory_space<vmem>>, %arg7: memref<1x1xf32, #tpu.memory_space<vmem>>, %arg8: memref<1x128xf32, #tpu.memory_space<vmem>>) attributes {dimension_semantics = [#tpu.dimension_semantics<parallel>], iteration_bounds = array<i64: 1>, scalar_prefetch = 0 : i64, scratch_operands = 0 : i64, tpu.core_type = #tpu.core_type<tc>, window_params = [{transform_indices = @transform_0, window_bounds = array<i64: 32, 128>}, {pipeline_mode = #tpu.pipeline_mode<synchronous>, transform_indices = @transform_1, window_bounds = array<i64: 64, 32>}, {pipeline_mode = #tpu.pipeline_mode<synchronous>, transform_indices = @transform_2, window_bounds = array<i64: 64, 1>}, {pipeline_mode = #tpu.pipeline_mode<synchronous>, transform_indices = @transform_3, window_bounds = array<i64: 32, 64>}, {pipeline_mode = #tpu.pipeline_mode<synchronous>, transform_indices = @transform_4, window_bounds = array<i64: 32, 1>}, {pipeline_mode = #tpu.pipeline_mode<synchronous>, transform_indices = @transform_5, window_bounds = array<i64: 32, 1>}, {pipeline_mode = #tpu.pipeline_mode<synchronous>, transform_indices = @transform_6, window_bounds = array<i64: 1, 1>}, {transform_indices = @transform_7, window_bounds = array<i64: 1, 128>}]} {
    %c0 = arith.constant 0 : index
    %c0_0 = arith.constant 0 : index
    %0 = vector.load %arg1[%c0, %c0_0] : memref<32x128xf32, #tpu.memory_space<vmem>>, vector<32x128xf32>
    %c0_1 = arith.constant 0 : index
    %c0_2 = arith.constant 0 : index
    %1 = vector.load %arg2[%c0_1, %c0_2] : memref<64x32xf32, #tpu.memory_space<vmem>>, vector<64x32xf32>
    %c0_3 = arith.constant 0 : index
    %c0_4 = arith.constant 0 : index
    %2 = vector.load %arg3[%c0_3, %c0_4] : memref<64x1xf32, #tpu.memory_space<vmem>>, vector<64x1xf32>
    %cst = arith.constant dense<0.000000e+00> : vector<64x128xf32>
    %3 = tpu.matmul %1, %0, %cst {dimension_numbers = #tpu.dot_dimension_numbers<[1], [0], [0], [1], [0, 0, 1, 1], [], []>} : vector<64x32xf32>, vector<32x128xf32>, vector<64x128xf32> -> vector<64x128xf32>
    %4 = vector.broadcast %2 : vector<64x1xf32> to vector<64x128xf32>
    %5 = arith.addf %3, %4 : vector<64x128xf32>
    %cst_5 = arith.constant 0.000000e+00 : f32
    %6 = vector.broadcast %cst_5 : f32 to vector<64x128xf32>
    %7 = arith.maximumf %5, %6 : vector<64x128xf32>
    %c0_6 = arith.constant 0 : index
    %c0_7 = arith.constant 0 : index
    %8 = vector.load %arg4[%c0_6, %c0_7] : memref<32x64xf32, #tpu.memory_space<vmem>>, vector<32x64xf32>
    %c0_8 = arith.constant 0 : index
    %c0_9 = arith.constant 0 : index
    %9 = vector.load %arg5[%c0_8, %c0_9] : memref<32x1xf32, #tpu.memory_space<vmem>>, vector<32x1xf32>
    %cst_10 = arith.constant dense<0.000000e+00> : vector<32x128xf32>
    %10 = tpu.matmul %8, %7, %cst_10 {dimension_numbers = #tpu.dot_dimension_numbers<[1], [0], [0], [1], [0, 0, 1, 1], [], []>} : vector<32x64xf32>, vector<64x128xf32>, vector<32x128xf32> -> vector<32x128xf32>
    %11 = vector.broadcast %9 : vector<32x1xf32> to vector<32x128xf32>
    %12 = arith.addf %10, %11 : vector<32x128xf32>
    %cst_11 = arith.constant 0.000000e+00 : f32
    %13 = vector.broadcast %cst_11 : f32 to vector<32x128xf32>
    %14 = arith.maximumf %12, %13 : vector<32x128xf32>
    %c0_12 = arith.constant 0 : index
    %c0_13 = arith.constant 0 : index
    %15 = vector.load %arg6[%c0_12, %c0_13] : memref<32x1xf32, #tpu.memory_space<vmem>>, vector<32x1xf32>
    %c0_14 = arith.constant 0 : index
    %c0_15 = arith.constant 0 : index
    %16 = vector.load %arg7[%c0_14, %c0_15] : memref<1x1xf32, #tpu.memory_space<vmem>>, vector<1x1xf32>
    %17 = vector.broadcast %15 : vector<32x1xf32> to vector<32x128xf32>
    %18 = arith.mulf %14, %17 : vector<32x128xf32>
    %cst_16 = arith.constant dense<0.000000e+00> : vector<128xf32>
    %19 = vector.multi_reduction <add>, %18, %cst_16 [0] : vector<32x128xf32> to vector<128xf32>
    %20 = vector.shape_cast %19 : vector<128xf32> to vector<1x128xf32>
    %21 = vector.broadcast %16 : vector<1x1xf32> to vector<1x128xf32>
    %22 = arith.addf %20, %21 : vector<1x128xf32>
    %23 = arith.negf %22 : vector<1x128xf32>
    %24 = math.exp %23 : vector<1x128xf32>
    %cst_17 = arith.constant 1.000000e+00 : f32
    %25 = vector.broadcast %cst_17 : f32 to vector<1x128xf32>
    %26 = arith.addf %25, %24 : vector<1x128xf32>
    %27 = arith.divf %25, %26 : vector<1x128xf32>
    %c0_18 = arith.constant 0 : index
    %c0_19 = arith.constant 0 : index
    %28 = vector.load %arg8[%c0_18, %c0_19] : memref<1x128xf32, #tpu.memory_space<vmem>>, vector<1x128xf32>
    tpu.vector_store %arg8[%c0_18, %c0_19], %27 {strides = array<i32>} : memref<1x128xf32, #tpu.memory_space<vmem>>, vector<1x128xf32>,
    return
  }
  func.func @transform_0(%arg0: i32) -> (i32, i32) {
    %c0_i32 = arith.constant 0 : i32
    %c0_i32_0 = arith.constant 0 : i32
    return %c0_i32, %arg0 : i32, i32
  }
  func.func @transform_1(%arg0: i32) -> (i32, i32) {
    %c0_i32 = arith.constant 0 : i32
    %c0_i32_0 = arith.constant 0 : i32
    %c0_i32_1 = arith.constant 0 : i32
    return %c0_i32, %c0_i32_0 : i32, i32
  }
  func.func @transform_2(%arg0: i32) -> (i32, i32) {
    %c0_i32 = arith.constant 0 : i32
    %c0_i32_0 = arith.constant 0 : i32
    %c0_i32_1 = arith.constant 0 : i32
    return %c0_i32, %c0_i32_0 : i32, i32
  }
  func.func @transform_3(%arg0: i32) -> (i32, i32) {
    %c0_i32 = arith.constant 0 : i32
    %c0_i32_0 = arith.constant 0 : i32
    %c0_i32_1 = arith.constant 0 : i32
    return %c0_i32, %c0_i32_0 : i32, i32
  }
  func.func @transform_4(%arg0: i32) -> (i32, i32) {
    %c0_i32 = arith.constant 0 : i32
    %c0_i32_0 = arith.constant 0 : i32
    %c0_i32_1 = arith.constant 0 : i32
    return %c0_i32, %c0_i32_0 : i32, i32
  }
  func.func @transform_5(%arg0: i32) -> (i32, i32) {
    %c0_i32 = arith.constant 0 : i32
    %c0_i32_0 = arith.constant 0 : i32
    %c0_i32_1 = arith.constant 0 : i32
    return %c0_i32, %c0_i32_0 : i32, i32
  }
  func.func @transform_6(%arg0: i32) -> (i32, i32) {
    %c0_i32 = arith.constant 0 : i32
    %c0_i32_0 = arith.constant 0 : i32
    %c0_i32_1 = arith.constant 0 : i32
    return %c0_i32, %c0_i32_0 : i32, i32
  }
  func.func @transform_7(%arg0: i32) -> (i32, i32) {
    %c0_i32 = arith.constant 0 : i32
    %c0_i32_0 = arith.constant 0 : i32
    return %c0_i32, %arg0 : i32, i32
  }
}

</mosaic_0001>

<bundles_post_ra>
// kernel: linear_and_out.1
= control target key start
LH: loop header
LB: loop body
LE: loop exit
PB: predicated region body
PF: predicated region fallthrough
CT: control target
= control target key end

     0   :  { %v338_v2 = vmov 0   ;;  %vm88_vm0 = vcmask 261120   ;;  %vm190_vm1 = vcmask 523264   ;;  %s489_s0 = inlined_call_operand.vmem [shape: f32[32,128], index: 0, kind: input, shape index: {}]   ;;  %s490_s2 = inlined_call_operand.vmem [shape: f32[64,1], index: 2, kind: input, shape index: {}]   ;;  %s491_s1 = inlined_call_operand.vmem [shape: f32[64,32], index: 1, kind: input, shape index: {}]   ;;  %s492_s6 = inlined_call_operand.<no memory space> [shape: f32[1,1], index: 6, kind: input, shape index: {}]   ;;  %s493_s4 = inlined_call_operand.vmem [shape: f32[32,1], index: 4, kind: input, shape index: {}]   ;;  %s494_s5 = inlined_call_operand.vmem [shape: f32[32,1], index: 5, kind: input, shape index: {}]   ;;  %s495_s3 = inlined_call_operand.vmem [shape: f32[32,64], index: 3, kind: input, shape index: {}]   ;;  %s496_s7 = inlined_call_operand.vmem [shape: f32[1,128], index: 7, kind: output, shape index: {}]  }
   0x1   :  { %v31_v0 = vld [vmem:[%s489_s0 + $0x18] sm:$0xff]  ;;  %v30_v1 = vld [vmem:[%s489_s0 + $0x10] sm:$0xff]  ;;  %331 = vset.pattern.permute.xlu0 %v338_v2  ;;  %332 = vset.pattern.permute.xlu1 %v338_v2  ;;  %v29_v4 = vld [vmem:[%s489_s0 + $0x8] sm:$0xff]  ;;  %v12_v12 = vstv %s492_s6 }
   0x2   :  { %318 = vmatpush.msra.mxu2 %v31_v0  ;;  %v47_v3 = vld [vmem:[%s490_s2 + $0x38] sm:$0xff]  ;;  %125 = vmatpush.msra.mxu0 %v31_v0  ;;  %v45_v5 = vld [vmem:[%s490_s2 + $0x28] sm:$0xff]  ;;  %v28_v6 = vld [vmem:[%s489_s0] sm:$0xff]  ;;  %13 = vst [vmem:[#allocation2] sm:$0x1] %v12_v12 }
   0x3   :  { %85 = vperm.xlu0 %331, %v47_v3   ;;  %333 = vset.pattern.permute.xlu2 %v338_v2  ;;  %v35_v7 = vld [vmem:[%s491_s1 + $0x18] sm:$0xff]  ;;  %v32_v8 = vld [vmem:[%s491_s1] sm:$0xff]  ;;  %v46_v9 = vld [vmem:[%s490_s2 + $0x30] sm:$0xff] }
   0x4   :  { %319 = vmatpush.msra.mxu2 %v30_v1  ;;  %75 = vperm.xlu1 %332, %v45_v5   ;;  %v44_v10 = vld [vmem:[%s490_s2 + $0x20] sm:$0xff]  ;;  %v43_v11 = vld [vmem:[%s490_s2 + $0x18] sm:$0xff]  ;;  %v33_v14 = vld [vmem:[%s491_s1 + $0x8] sm:$0xff] }
   0x5   :  { %126 = vmatpush.msra.mxu0 %v30_v1  ;;  %65 = vperm.xlu2 %333, %v43_v11   ;;  %v36_v13 = vld [vmem:[%s491_s1 + $0x20] sm:$0xff]  ;;  %v41_v15 = vld [vmem:[%s490_s2 + $0x8] sm:$0xff]  ;;  %v42_v16 = vld [vmem:[%s490_s2 + $0x10] sm:$0xff] }
   0x6   :  { %320 = vmatpush.msra.mxu2 %v29_v4  ;;  %v40_v17 = vld [vmem:[%s490_s2] sm:$0xff]  ;;  %v37_v18 = vld [vmem:[%s491_s1 + $0x28] sm:$0xff]  ;;  %v34_v19 = vld [vmem:[%s491_s1 + $0x10] sm:$0xff] }
   0x7   :  { %127 = vmatpush.msra.mxu0 %v29_v4  ;;  %v167_v20 = vld [vmem:[%s493_s4 + $0x8] sm:$0xff]  ;;  %v166_v21 = vld [vmem:[%s493_s4] sm:$0xff]  ;;  %v168_v22 = vld [vmem:[%s493_s4 + $0x10] sm:$0xff] }
   0x8   :  { %321 = vmatpush.msra.mxu2 %v28_v6  ;;  %v38_v23 = vld [vmem:[%s491_s1 + $0x30] sm:$0xff]  ;;  %v236_v24 = vld [vmem:[%s494_s5] sm:$0xff]  ;;  %v169_v25 = vld [vmem:[%s493_s4 + $0x18] sm:$0xff] }
   0x9   :  { %308 = vmatmul.msk.f32.vlgmr.msra.gmra.mxu2 %vm88_vm0, %v35_v7  ;;  %128 = vmatpush.msra.mxu0 %v28_v6  ;;  %v237_v26 = vld [vmem:[%s494_s5 + $0x8] sm:$0xff]  ;;  %v39_v27 = vld [vmem:[%s491_s1 + $0x38] sm:$0xff]  ;;  %v238_v29 = vld [vmem:[%s494_s5 + $0x10] sm:$0xff] }
   0xa   :  { %305 = vmatmul.msk.f32.vlgmr.msra.gmra.mxu0 %vm88_vm0, %v32_v8  ;;  %v239_v28 = vld [vmem:[%s494_s5 + $0x18] sm:$0xff]  ;;  %v240_v30 = vld [vmem:[#allocation2] sm:$0x1]  ;;  %v163_v0 = vld [vmem:[%s495_s3 + $0x8] sm:$0xff] }
   0xb   :  { %80 = vperm.xlu0 %331, %v46_v9   ;;  %v162_v63 = vld [vmem:[%s495_s3] sm:$0xff]  ;;  %v164_v1 = vld [vmem:[%s495_s3 + $0x10] sm:$0xff]  ;;  %v165_v2 = vld [vmem:[%s495_s3 + $0x18] sm:$0xff] }
   0xc   :  { %70 = vperm.xlu1 %332, %v44_v10  }
   0xd   :  { %60 = vperm.xlu2 %333, %v42_v16  }
  0x11   :  { %309 = vmatmul.msk.f32.gmra.mxu2 %vm88_vm0, %v36_v13 }
  0x12   :  { %306 = vmatmul.msk.f32.gmra.mxu0 %vm88_vm0, %v33_v14 }
  0x13   :  { %55 = vperm.xlu0 %331, %v41_v15  }
  0x14   :  { %50 = vperm.xlu1 %332, %v40_v17  }
  0x15   :  { %172 = vperm.xlu2 %333, %v166_v21  }
  0x19   :  { %310 = vmatmul.msk.f32.gmra.mxu2 %vm88_vm0, %v37_v18 }
  0x1a   :  { %307 = vmatmul.msk.f32.gmra.mxu0 %vm88_vm0, %v34_v19 }
  0x1b   :  { %177 = vperm.xlu0 %331, %v167_v20  }
  0x1c   :  { %182 = vperm.xlu1 %332, %v168_v22  }
  0x1d   :  { %187 = vperm.xlu2 %333, %v169_v25  }
  0x21   :  { %311 = vmatmul.msk.f32.gmra.mxu2 %vm88_vm0, %v38_v23 }
  0x23   :  { %243 = vperm.xlu0 %331, %v236_v24  }
  0x24   :  { %248 = vperm.xlu1 %332, %v237_v26  }
  0x25   :  { %253 = vperm.xlu2 %333, %v238_v29  }
  0x29   :  { %312 = vmatmul.msk.f32.gmra.mxu2 %vm88_vm0, %v39_v27 }
  0x2b   :  { %258 = vperm.xlu0 %331, %v239_v28  }
  0x2c   :  { %276 = vperm.xlu1 %332, %v240_v30  }
  0x5f   :  { %v66_v39 = vpop.permute.xlu2 %65 }
  0x67   :  { %v61_v52 = vpop.permute.xlu2 %60 }
  0x6f   :  { %v173_v3 = vpop.permute.xlu2 %172 }
  0x75   :  { %v86_v35 = vpop.permute.xlu0 %85 }
  0x76   :  { %v76_v36 = vpop.permute.xlu1 %75 }
  0x77   :  { %v188_v7 = vpop.permute.xlu2 %187 }
  0x7d   :  { %v81_v40 = vpop.permute.xlu0 %80 }
  0x7e   :  { %v71_v44 = vpop.permute.xlu1 %70 }
  0x7f   :  { %v254_v19 = vpop.permute.xlu2 %253 }
  0x85   :  { %v56_v55 = vpop.permute.xlu0 %55 }
  0x86   :  { %v51_v58 = vpop.permute.xlu1 %50 }
  0x87   :  { %v130_v34 = vpop.f32.mrf.mxu0 }
  0x88   :  { %v131_v59 = vadd.f32 %v130_v34, %v51_v58 }
  0x8a   :  { %v154_v62 = vmax.f32 %v131_v59, 0.0 }
  0x8c   :  { %v139_v31 = vpop.f32.mrf.mxu2 }
  0x8d   :  { %v140_v50 = vadd.f32 %v139_v31, %v66_v39  ;;  %v178_v4 = vpop.permute.xlu0 %177 }
  0x8e   :  { %v183_v6 = vpop.permute.xlu1 %182 }
  0x8f   :  { %v133_v38 = vpop.f32.mrf.mxu0  ;;  %v157_v56 = vmax.f32 %v140_v50, 0.0 }
  0x90   :  { %v134_v57 = vadd.f32 %v133_v38, %v56_v55 }
  0x92   :  { %v155_v61 = vmax.f32 %v134_v57, 0.0 }
  0x94   :  { %v142_v32 = vpop.f32.mrf.mxu2 }
  0x95   :  { %v143_v47 = vadd.f32 %v142_v32, %v71_v44  ;;  %v244_v13 = vpop.permute.xlu0 %243 }
  0x96   :  { %v249_v17 = vpop.permute.xlu1 %248 }
  0x97   :  { %v136_v49 = vpop.f32.mrf.mxu0  ;;  %v158_v53 = vmax.f32 %v143_v47, 0.0 }
  0x98   :  { %v137_v54 = vadd.f32 %v136_v49, %v61_v52 }
  0x9a   :  { %v156_v60 = vmax.f32 %v137_v54, 0.0 }
  0x9c   :  { %v145_v33 = vpop.f32.mrf.mxu2 }
  0x9d   :  { %v146_v45 = vadd.f32 %v145_v33, %v76_v36  ;;  %v259_v26 = vpop.permute.xlu0 %258 }
  0x9e   :  { %v277_v34 = vpop.permute.xlu1 %276 }
  0x9f   :  { %v159_v51 = vmax.f32 %v146_v45, 0.0  ;;  %v279_v36 = vperm.slane %v277_v34, 0 }
  0xa4   :  { %v148_v37 = vpop.f32.mrf.mxu2 }
  0xa5   :  { %v149_v42 = vadd.f32 %v148_v37, %v81_v40 }
  0xa7   :  { %v160_v48 = vmax.f32 %v149_v42, 0.0 }
  0xac   :  { %v151_v41 = vpop.f32.mrf.mxu2 }
  0xad   :  { %v152_v43 = vadd.f32 %v151_v41, %v86_v35 }
  0xaf   :  { %v161_v46 = vmax.f32 %v152_v43, 0.0 }
  0xb1   :  { %211 = vmatpush.msra.mxu1 %v161_v46  ;;  %322 = vmatpush.msra.mxu3 %v161_v46 }
  0xb3   :  { %212 = vmatpush.msra.mxu1 %v160_v48  ;;  %323 = vmatpush.msra.mxu3 %v160_v48 }
  0xb5   :  { %213 = vmatpush.msra.mxu1 %v159_v51  ;;  %324 = vmatpush.msra.mxu3 %v159_v51 }
  0xb7   :  { %214 = vmatpush.msra.mxu1 %v158_v53  ;;  %325 = vmatpush.msra.mxu3 %v158_v53 }
  0xb9   :  { %215 = vmatpush.msra.mxu1 %v157_v56  ;;  %326 = vmatpush.msra.mxu3 %v157_v56 }
  0xbb   :  { %216 = vmatpush.msra.mxu1 %v156_v60  ;;  %327 = vmatpush.msra.mxu3 %v156_v60 }
  0xbd   :  { %217 = vmatpush.msra.mxu1 %v155_v61  ;;  %328 = vmatpush.msra.mxu3 %v155_v61 }
  0xbf   :  { %218 = vmatpush.msra.mxu1 %v154_v62  ;;  %329 = vmatpush.msra.mxu3 %v154_v62 }
  0xc0   :  { %313 = vmatmul.msk.f32.vlgmr.msra.gmra.mxu1 %vm190_vm1, %v162_v63  ;;  %314 = vmatmul.msk.f32.vlgmr.msra.gmra.mxu3 %vm190_vm1, %v163_v0 }
  0xc8   :  { %315 = vmatmul.msk.f32.gmra.mxu3 %vm190_vm1, %v164_v1 }
  0xd0   :  { %316 = vmatmul.msk.f32.gmra.mxu3 %vm190_vm1, %v165_v2 }
 0x13d   :  { %v220_v8 = vpop.f32.mrf.mxu1 }
 0x13e   :  { %v221_v11 = vadd.f32 %v220_v8, %v173_v3 }
 0x140   :  { %v232_v15 = vmax.f32 %v221_v11, 0.0 }
 0x142   :  { %v261_v21 = vmul.f32 %v244_v13, %v232_v15 }
 0x143   :  { %v223_v5 = vpop.f32.mrf.mxu3 }
 0x144   :  { %v224_v9 = vadd.f32 %v223_v5, %v178_v4 }
 0x146   :  { %v233_v14 = vmax.f32 %v224_v9, 0.0 }
 0x148   :  { %v262_v18 = vmul.f32 %v249_v17, %v233_v14 }
 0x14a   :  { %v265_v24 = vadd.f32 %v262_v18, %v261_v21 }
 0x14b   :  { %v226_v10 = vpop.f32.mrf.mxu3 }
 0x14c   :  { %v227_v12 = vadd.f32 %v226_v10, %v183_v6 }
 0x14e   :  { %v234_v16 = vmax.f32 %v227_v12, 0.0 }
 0x150   :  { %v263_v22 = vmul.f32 %v254_v19, %v234_v16 }
 0x152   :  { %v266_v27 = vadd.f32 %v265_v24, %v263_v22 }
 0x153   :  { %v229_v20 = vpop.f32.mrf.mxu3 }
 0x154   :  { %v230_v23 = vadd.f32 %v229_v20, %v188_v7 }
 0x156   :  { %v235_v25 = vmax.f32 %v230_v23, 0.0 }
 0x158   :  { %v264_v28 = vmul.f32 %v259_v26, %v235_v25 }
 0x15a   :  { %v267_v29 = vadd.f32 %v266_v27, %v264_v28 }
 0x15c   :  { %v268_v30 = vrot.slane %v267_v29, 4 }
 0x15e   :  { %v269_v31 = vadd.f32 %v268_v30, %v267_v29 }
 0x160   :  { %v270_v32 = vrot.slane %v269_v31, 2 }
 0x162   :  { %v271_v33 = vadd.f32 %v270_v32, %v269_v31 }
 0x164   :  { %v272_v35 = vrot.slane %v271_v33, 1 }
 0x166   :  { %v273_v37 = vadd.f32 %v272_v35, %v271_v33 }
 0x168   :  { %v280_v38 = vadd.f32 %v279_v36, %v273_v37 }
 0x16a   :  { %v317_v39 = vmul.f32 -1.442695, %v280_v38 }
 0x16c   :  { %334 = vpow2.f32 %v317_v39 }
 0x172   :  { %v335_v40 = vpop.eup %334 }
 0x173   :  { %v284_v41 = vadd.f32 1.0, %v335_v40 }
 0x175   :  { %336 = vrcp.f32 %v284_v41  ;;  %v296_v45 = vand.u32 2147483648, %v284_v41  ;;  %v294_v47 = vand.u32 2147483647, %v284_v41  ;;  %vm290_vm3 = vweird.f32 %v284_v41 }
 0x177   :  { %v297_v49 = vor.u32 1.1754944e-38, %v296_v45  ;;  %vm295_vm5 = vcmp.eq.f32.partialorder %v294_v47, 8.507059e+37 }
 0x17b   :  { %v337_v42 = vpop.eup %336 }
 0x17c   :  { %v286_v43 = vmul.f32 %v337_v42, %v284_v41  ;;  %vm291_vm2 = vweird.f32 %v337_v42 }
 0x17d   :  { %vm292_vm4 = vmor %vm290_vm3, %vm291_vm2 }
 0x17e   :  { %v287_v44 = vsub.f32 1.0, %v286_v43 }
 0x180   :  { %v288_v46 = vmul.f32 %v337_v42, %v287_v44 }
 0x182   :  { %v289_v48 = vadd.f32 %v337_v42, %v288_v46 }
 0x184   :  { %v293_v50 = vsel %vm292_vm4, %v337_v42, %v289_v48 }
 0x185   :  { %v298_v51 = vsel %vm295_vm5, %v297_v49, %v293_v50 }
 0x186   :  { %300 = vst [vmem:[%s496_s7] sm:$0x1] %v298_v51 }

</bundles_post_ra>
